<compile_context>
chip_gen: v7x
topology: tpu7x:2x2x1
jax: 0.10.0
libtpu: 0.0.40
codegen_flags: <defaults>
</compile_context>

<pallas_src>
import math
import functools

import jax
import jax.numpy as jnp
from jax.experimental import pallas as pl
from jax.experimental.pallas import tpu as pltpu


_VMEM_LIMIT_BYTES = 32 * 1024 * 1024    # <= physical VMEM on v5e/v6e/v7x
_BLOCK_BUDGET_BYTES = 12 * 1024 * 1024  # blocks + in-kernel temps, headroom under limit


def _sincos_pe(S, D):
    """Sinusoidal positional encoding table of shape (S, D), float32."""
    if D % 2 == 0:
        pos = jnp.arange(S, dtype=jnp.float32)[:, None]              # (S, 1)
        i = jnp.arange(D // 2, dtype=jnp.float32)[None, :]           # (1, D/2)
        inv_freq = jnp.exp(-(2.0 * i / float(D)) * math.log(10000.0))
        angle = pos * inv_freq                                       # (S, D/2)
        # Interleave: [sin0, cos0, sin1, cos1, ...]
        pe = jnp.stack([jnp.sin(angle), jnp.cos(angle)], axis=-1).reshape(S, D)
    else:
        pos = jax.lax.broadcasted_iota(jnp.float32, (S, D), 0)
        dim = jax.lax.broadcasted_iota(jnp.int32, (S, D), 1)
        half = (dim // 2).astype(jnp.float32)
        inv_freq = jnp.exp(-(2.0 * half / float(D)) * math.log(10000.0))
        angle = pos * inv_freq
        pe = jnp.where(dim % 2 == 0, jnp.sin(angle), jnp.cos(angle))
    return pe


# ---------------------------------------------------------------------------
# Kernels
# ---------------------------------------------------------------------------

def pe_add_kernel(pe_ref, x_ref, o_ref):
    # pe_ref: (tS, D) in x.dtype; x_ref / o_ref: (1, tS, D)
    # Native-dtype add: no f32 temporary; output rounds to o.dtype regardless.
    o_ref[...] = (x_ref[...] + pe_ref[...][None]).astype(o_ref.dtype)


def pe_cat_slab_kernel(pe_ref, x_ref, o_ref, *, D):
    # D % 128 == 0: two unmasked lane-aligned slab stores, no concat temporary.
    o_ref[:, :, :D] = x_ref[...].astype(o_ref.dtype)
    o_ref[:, :, D:] = pe_ref[...][None].astype(o_ref.dtype)


def pe_cat_concat_kernel(pe_ref, x_ref, o_ref):
    # D not lane-aligned: build the full block and do one full-block store.
    o_ref[...] = jnp.concatenate(
        [x_ref[...].astype(o_ref.dtype), pe_ref[...][None].astype(o_ref.dtype)],
        axis=-1)


# ---------------------------------------------------------------------------
# Tiling helpers
# ---------------------------------------------------------------------------

def _pick_seq_tile(S, D, out_d, x_itemsize, pe_itemsize, sub, temp_row_bytes):
    """Sequence-tile rows keeping (double-buffered blocks + temps) <= budget."""
    per_row = (2 * (D * x_itemsize            # x block (double-buffered)
                    + out_d * x_itemsize      # out block (double-buffered)
                    + D * pe_itemsize)        # pe block (double-buffered)
               + temp_row_bytes)              # in-kernel temporaries
    ts = _BLOCK_BUDGET_BYTES // per_row
    if ts >= S:
        return S
    return max(sub, (ts // sub) * sub)        # dtype-aware sublane packing


# ---------------------------------------------------------------------------
# Wrapper
# ---------------------------------------------------------------------------

@functools.partial(jax.jit, static_argnames=("mode",))
def positional_encoding(x, mode="add"):
    B, S, D = x.shape
    if mode not in ("add", "cat"):
        raise ValueError(f"mode {mode} not supported")

    # Precompute the PE table once; stream it in x's dtype (bf16 PE for bf16 x).
    pe = _sincos_pe(S, D)
    if jnp.issubdtype(x.dtype, jnp.floating):
        pe = pe.astype(x.dtype)

    itemsize = x.dtype.itemsize
    pe_itemsize = pe.dtype.itemsize
    sub = 8 * max(1, 4 // itemsize)          # f32 -> 8, bf16 -> 16, int8/fp8 -> 32

    # Lane-folding for 'add': fold sequence rows into the 128-lane axis so
    # every store is an unmasked full-lane vst even when D is not 128-aligned.
    fold = (mode == "add") and (D % 128 != 0) and ((S * D) % 128 == 0)
    if fold:
        S_eff, D_eff = (S * D) // 128, 128
        x_in = x.reshape(B, S_eff, D_eff)
        pe_in = pe.reshape(S_eff, D_eff)
    else:
        S_eff, D_eff = S, D
        x_in = x
        pe_in = pe

    if mode == "add":
        out_d = D_eff
        kernel = pe_add_kernel
        temp_row_bytes = 0
    else:  # 'cat'
        out_d = 2 * D_eff
        if D_eff % 128 == 0:
            kernel = functools.partial(pe_cat_slab_kernel, D=D_eff)
            temp_row_bytes = 0
        else:
            kernel = pe_cat_concat_kernel
            temp_row_bytes = out_d * itemsize   # concatenated temporary

    ts = _pick_seq_tile(S_eff, D_eff, out_d, itemsize, pe_itemsize, sub,
                        temp_row_bytes)
    # v7x has 2 TensorCores: make sure the parallel grid has >= 2 slices when B == 1.
    if B == 1 and ts >= S_eff and S_eff >= 2 * sub:
        ts = max(sub, ((S_eff // 2) // sub) * sub)
    num_s = pl.cdiv(S_eff, ts)

    # Grid order (s_tile, b): batch innermost -> PE block index is constant
    # across consecutive steps, so Pallas skips re-DMA of the PE tile.
    out = pl.pallas_call(
        kernel,
        out_shape=jax.ShapeDtypeStruct((B, S_eff, out_d), x.dtype),
        grid=(num_s, B),
        in_specs=[
            pl.BlockSpec((ts, D_eff), lambda s, b: (s, 0)),          # pe (batch-invariant)
            pl.BlockSpec((1, ts, D_eff), lambda s, b: (b, s, 0)),    # x
        ],
        out_specs=pl.BlockSpec((1, ts, out_d), lambda s, b: (b, s, 0)),
        compiler_params=pltpu.CompilerParams(
            dimension_semantics=("parallel", "parallel"),
            vmem_limit_bytes=_VMEM_LIMIT_BYTES,
        ),
    )(pe_in, x_in)

    if fold:
        out = out.reshape(B, S, D)
    return out


# ---------------------------------------------------------------------------
# Pure-JAX reference and self-test
# ---------------------------------------------------------------------------

def positional_encoding_ref(x, mode="add"):
    """Pure-JAX reference mirroring the PyTorch forward semantics."""
    B, S, D = x.shape
    pe = _sincos_pe(S, D)
    pe_b = jnp.broadcast_to(pe[None], (B, S, D))
    if mode == "add":
        return (x.astype(jnp.float32) + pe_b).astype(x.dtype)
    elif mode == "cat":
        return jnp.concatenate((x, pe_b.astype(x.dtype)), axis=-1)
    raise ValueError(mode)


if __name__ == "__main__":
    key = jax.random.PRNGKey(0)
    B, S, D = 2, 8, 32
    x = jax.random.normal(key, (B, S, D), dtype=jnp.float32)

    # mode='add' (default in the module) — exercises the lane-folded path (D=32).
    out_add = jax.block_until_ready(positional_encoding(x, mode="add"))
    ref_add = positional_encoding_ref(x, mode="add")
    assert out_add.shape == (B, S, D)
    assert jnp.allclose(out_add, ref_add, atol=1e-5, rtol=1e-5)

    # mode='cat' — exercises the concat path (2D=64, not lane-aligned).
    out_cat = jax.block_until_ready(positional_encoding(x, mode="cat"))
    ref_cat = positional_encoding_ref(x, mode="cat")
    assert out_cat.shape == (B, S, 2 * D)
    assert jnp.allclose(out_cat, ref_cat, atol=1e-5, rtol=1e-5)

    # bf16 'add' — exercises bf16 PE streaming, native bf16 add, sublane pack 16.
    x_bf = x.astype(jnp.bfloat16)
    out_bf = jax.block_until_ready(positional_encoding(x_bf, mode="add"))
    ref_bf = positional_encoding_ref(x_bf, mode="add")
    assert out_bf.shape == (B, S, D)
    assert jnp.allclose(out_bf.astype(jnp.float32), ref_bf.astype(jnp.float32),
                        atol=3e-2, rtol=3e-2)

    print("KERNEL_OK")
</pallas_src>

<mosaic_0001>
module attributes {stable_mosaic.version = 11 : i64} {
  func.func @pe_add_kernel(%arg0: i32, %arg1: i32, %arg2: memref<2x128xf32, #tpu.memory_space<vmem>>, %arg3: memref<1x2x128xf32, #tpu.memory_space<vmem>>, %arg4: memref<1x2x128xf32, #tpu.memory_space<vmem>>) attributes {dimension_semantics = [#tpu.dimension_semantics<parallel>, #tpu.dimension_semantics<parallel>], iteration_bounds = array<i64: 1, 2>, scalar_prefetch = 0 : i64, scratch_operands = 0 : i64, tpu.core_type = #tpu.core_type<tc>, window_params = [{transform_indices = @transform_0, window_bounds = array<i64: 2, 128>}, {transform_indices = @transform_1, window_bounds = array<i64: 1, 2, 128>}, {transform_indices = @transform_2, window_bounds = array<i64: 1, 2, 128>}]} {
    %c0 = arith.constant 0 : index
    %c0_0 = arith.constant 0 : index
    %c0_1 = arith.constant 0 : index
    %0 = vector.load %arg3[%c0, %c0_0, %c0_1] : memref<1x2x128xf32, #tpu.memory_space<vmem>>, vector<1x2x128xf32>
    %c0_2 = arith.constant 0 : index
    %c0_3 = arith.constant 0 : index
    %1 = vector.load %arg2[%c0_2, %c0_3] : memref<2x128xf32, #tpu.memory_space<vmem>>, vector<2x128xf32>
    %2 = vector.shape_cast %1 : vector<2x128xf32> to vector<1x2x128xf32>
    %3 = arith.addf %0, %2 : vector<1x2x128xf32>
    %c0_4 = arith.constant 0 : index
    %c0_5 = arith.constant 0 : index
    %c0_6 = arith.constant 0 : index
    %4 = vector.load %arg4[%c0_4, %c0_5, %c0_6] : memref<1x2x128xf32, #tpu.memory_space<vmem>>, vector<1x2x128xf32>
    tpu.vector_store %arg4[%c0_4, %c0_5, %c0_6], %3 {strides = array<i32>} : memref<1x2x128xf32, #tpu.memory_space<vmem>>, vector<1x2x128xf32>,
    return
  }
  func.func @transform_0(%arg0: i32, %arg1: i32) -> (i32, i32) {
    %c0_i32 = arith.constant 0 : i32
    %c0_i32_0 = arith.constant 0 : i32
    return %arg0, %c0_i32 : i32, i32
  }
  func.func @transform_1(%arg0: i32, %arg1: i32) -> (i32, i32, i32) {
    %c0_i32 = arith.constant 0 : i32
    %c0_i32_0 = arith.constant 0 : i32
    return %arg1, %arg0, %c0_i32 : i32, i32, i32
  }
  func.func @transform_2(%arg0: i32, %arg1: i32) -> (i32, i32, i32) {
    %c0_i32 = arith.constant 0 : i32
    %c0_i32_0 = arith.constant 0 : i32
    return %arg1, %arg0, %c0_i32 : i32, i32, i32
  }
}

</mosaic_0001>

<bundles_post_ra>
// kernel: positional_encoding.1
= control target key start
LH: loop header
LB: loop body
LE: loop exit
PB: predicated region body
PF: predicated region fallthrough
CT: control target
= control target key end

     0   :  { %s354_s9 = smov 0   ;;  %s331_s10 = smov 0   ;;  %s368_s0 = inlined_call_operand.vmem [shape: f32[2,128], index: 0, kind: input, shape index: {}]   ;;  %s369_s1 = inlined_call_operand.vmem [shape: f32[2,2,128], index: 1, kind: input, shape index: {}]   ;;  %s370_s2 = inlined_call_operand.vmem [shape: f32[2,2,128], index: 2, kind: output, shape index: {}]  }
   0x1   :  { %s335_s11 = smov 0  }
   0x2 LB: > { %s21_s12 = sadd.s32 1, %s333_s10  ;;  %p286_p0 = scmp.ge.s32.totalorder %s337_s11, 1  ;;  %s337_s11 = sphi %s335_s11, %s12_s11   ;;  %s333_s10 = sphi %s331_s10, %s332_s10   ;;  %s329_s9 = sphi %s354_s9, %s371_s9  }
   0x3   : > { %p22_p1 = scmp.ge.s32.totalorder %s21_s12, 2  ;;  %p139_p2 = scmp.lt.s32.totalorder %s337_s11, 3 }
   0x5   : > { %s373_s12 = smov (%p22_p1, %s21_s12), 0  ;;  %p140_p3 = pnand %p286_p0, %p139_p2 }
   0x6   : > { %p173_p4 = scmp.lt.s32.totalorder (!%p140_p3), %s329_s9, 1  ;;  %v188_v0 = vld [vmem:[%s368_s0] sm:$0x3] (!%p140_p3) }
   0x7   : > { %143 = sbr.rel (%p140_p3) target bundleno = 21 (0x15), region = 28 }
   0xe   : > { %s375_s9 = smov (!%p173_p4, %s329_s9), 1 }
   0xf   : > { %s287_s13 = sshll.u32 %s375_s9, 1 }
  0x10   : > { %s179_s18 = scalar_lea.vmem %s369_s1, %s287_s13  ;;  %s186_s21 = scalar_lea.vmem %s370_s2, %s287_s13 }
  0x11   : > { %v187_v1 = vld [vmem:[%s179_s18] sm:$0x3] }
  0x12   : > { %v189_v2 = vadd.f32 %v188_v0, %v187_v1 }
  0x14   : > { %190 = vst [vmem:[%s186_s21] sm:$0x3] %v189_v2 }
  0x15 PF: > { %s12_s11 = sadd.s32 1, %s337_s11   ;;  %s371_s9 = smov %s333_s10 }
  0x16   : > { %p9_p5 = scmp.ge.s32.totalorder %s12_s11, 4   ;;  %s332_s10 = smov %s373_s12  }
  0x18   :  { %11 = sbr.rel (!%p9_p5) target bundleno = 2 (0x2), region = 61 }

</bundles_post_ra>
